<compile_context>
chip_gen: v5e
topology: v5e:2x2
jax: 0.10.0
libtpu: 0.0.40
codegen_flags: <defaults>
</compile_context>

<pallas_src>
import jax
import jax.numpy as jnp
from jax.experimental import pallas as pl
from jax.experimental.pallas import tpu as pltpu

_LANE = 128          # lane width: pad output features to a multiple of this
_TILE_B = 256        # batch tile for the large-batch (gridded) path
_SMALL_BATCH = 256   # below this, skip the grid entirely


def _actor_kernel(max_action: float):
    def kernel(x_ref, w_ref, o_ref):
        # x_ref: (tile_B, state_dim), w_ref: (state_dim, n_pad) -- MXU matmul,
        # f32 accumulation, tanh on the EUP, scale on the VPU.
        logits = jnp.dot(
            x_ref[...], w_ref[...], preferred_element_type=jnp.float32
        )
        o_ref[...] = (max_action * jnp.tanh(logits)).astype(o_ref.dtype)

    return kernel


def actor_forward(x: jax.Array, w_t: jax.Array, max_action: float) -> jax.Array:
    """x: [B, state_dim] f32, w_t: [state_dim, action_dim] f32 (= torch weight.T)."""
    B, K = x.shape
    Kw, A = w_t.shape
    assert K == Kw, "weight/in-feature mismatch"

    # Lane-dense padding of the output-feature axis (zeros -> tanh(0)=0, sliced off).
    n_pad = ((A + _LANE - 1) // _LANE) * _LANE
    if n_pad != A:
        w_pad = jnp.zeros((K, n_pad), w_t.dtype).at[:, :A].set(w_t)
    else:
        w_pad = w_t

    kernel = _actor_kernel(float(max_action))
    itemsize = jnp.dtype(x.dtype).itemsize
    cost = pl.CostEstimate(
        flops=2 * B * K * n_pad,
        transcendentals=B * n_pad,
        bytes_accessed=(B * K + K * n_pad + B * n_pad) * itemsize,
    )

    if B <= _SMALL_BATCH:
        # No grid: whole arrays resident in VMEM, single kernel body invocation.
        out = pl.pallas_call(
            kernel,
            out_shape=jax.ShapeDtypeStruct((B, n_pad), x.dtype),
            cost_estimate=cost,
        )(x, w_pad)
        return out[:, :A]

    # Large-batch path: tile the batch axis; weight block is constant so it
    # stays VMEM-resident across grid steps. Batch axis marked "parallel"
    # (exploits v7x's 2 TensorCores). VMEM use per step:
    #   2*(TILE_B*K*4) + K*n_pad*4 + 2*(TILE_B*n_pad*4)  << 32 MiB scoped limit.
    B_pad = ((B + _TILE_B - 1) // _TILE_B) * _TILE_B
    x_pad = x if B_pad == B else jnp.zeros((B_pad, K), x.dtype).at[:B].set(x)
    out = pl.pallas_call(
        kernel,
        out_shape=jax.ShapeDtypeStruct((B_pad, n_pad), x.dtype),
        grid=(B_pad // _TILE_B,),
        in_specs=[
            pl.BlockSpec((_TILE_B, K), lambda i: (i, 0)),
            pl.BlockSpec((K, n_pad), lambda i: (0, 0)),
        ],
        out_specs=pl.BlockSpec((_TILE_B, n_pad), lambda i: (i, 0)),
        compiler_params=pltpu.CompilerParams(
            dimension_semantics=("parallel",)
        ),
        cost_estimate=cost,
    )(x_pad, w_pad)
    return out[:B, :A]


if __name__ == "__main__":
    # Small shapes consistent with the module: state_dim=16, action_dim=8, batch=2
    state_dim, action_dim = 16, 8
    max_action = 2.0

    key = jax.random.PRNGKey(0)
    kx, kw, kx2 = jax.random.split(key, 3)

    # Deterministic init mimicking nn.Linear's uniform(-1/sqrt(in), 1/sqrt(in)).
    bound = 1.0 / (state_dim ** 0.5)
    w = jax.random.uniform(
        kw, (action_dim, state_dim), minval=-bound, maxval=bound, dtype=jnp.float32
    )  # torch layout: [out_features, in_features]
    w_t = w.T  # kernel layout: [state_dim, action_dim]

    # --- small-batch (no-grid) path ---
    batch = 2
    x = jax.random.normal(kx, (batch, state_dim), dtype=jnp.float32)
    out = jax.block_until_ready(actor_forward(x, w_t, max_action))
    ref = max_action * jnp.tanh(x @ w.T)
    assert out.shape == (batch, action_dim)
    assert jnp.allclose(out, ref, atol=1e-5, rtol=1e-5)

    # --- large-batch (gridded, batch-tiled) path ---
    big_batch = 512
    x_big = jax.random.normal(kx2, (big_batch, state_dim), dtype=jnp.float32)
    out_big = jax.block_until_ready(actor_forward(x_big, w_t, max_action))
    ref_big = max_action * jnp.tanh(x_big @ w.T)
    assert out_big.shape == (big_batch, action_dim)
    assert jnp.allclose(out_big, ref_big, atol=1e-5, rtol=1e-5)

    print("KERNEL_OK")
</pallas_src>

<mosaic_0001>
module attributes {stable_mosaic.version = 11 : i64} {
  func.func @kernel(%arg0: memref<2x16xf32, #tpu.memory_space<vmem>>, %arg1: memref<16x128xf32, #tpu.memory_space<vmem>>, %arg2: memref<2x128xf32, #tpu.memory_space<vmem>>) attributes {dimension_semantics = [], scalar_prefetch = 0 : i64, scratch_operands = 0 : i64, tpu.core_type = #tpu.core_type<tc>} {
    %c0 = arith.constant 0 : index
    %c0_0 = arith.constant 0 : index
    %0 = vector.load %arg0[%c0, %c0_0] : memref<2x16xf32, #tpu.memory_space<vmem>>, vector<2x16xf32>
    %c0_1 = arith.constant 0 : index
    %c0_2 = arith.constant 0 : index
    %1 = vector.load %arg1[%c0_1, %c0_2] : memref<16x128xf32, #tpu.memory_space<vmem>>, vector<16x128xf32>
    %cst = arith.constant dense<0.000000e+00> : vector<2x128xf32>
    %2 = tpu.matmul %0, %1, %cst {dimension_numbers = #tpu.dot_dimension_numbers<[1], [0], [0], [1], [0, 0, 1, 1], [], []>} : vector<2x16xf32>, vector<16x128xf32>, vector<2x128xf32> -> vector<2x128xf32>
    %3 = math.tanh %2 : vector<2x128xf32>
    %cst_3 = arith.constant 2.000000e+00 : f32
    %4 = vector.broadcast %cst_3 : f32 to vector<2x128xf32>
    %5 = arith.mulf %4, %3 : vector<2x128xf32>
    %c0_4 = arith.constant 0 : index
    %c0_5 = arith.constant 0 : index
    %6 = vector.load %arg2[%c0_4, %c0_5] : memref<2x128xf32, #tpu.memory_space<vmem>>, vector<2x128xf32>
    tpu.vector_store %arg2[%c0_4, %c0_5], %5 {strides = array<i32>} : memref<2x128xf32, #tpu.memory_space<vmem>>, vector<2x128xf32>,
    return
  }
}

</mosaic_0001>

<bundles_post_ra>
// kernel: tpu_custom_call.1
= control target key start
LH: loop header
LB: loop body
LE: loop exit
PB: predicated region body
PF: predicated region fallthrough
CT: control target
= control target key end

     0   :  { %7 = vsyncpa [#allocation3], 0  ;;  %s205_s0 = inlined_call_operand.hbm [shape: f32[2,16], index: 0, kind: input, shape index: {}]   ;;  %s206_s1 = inlined_call_operand.hbm [shape: f32[16,128], index: 1, kind: input, shape index: {}]   ;;  %s207_s2 = inlined_call_operand.hbm [shape: f32[2,128], index: 2, kind: output, shape index: {}]  }
   0x1   :  { %8 = vsyncpa [#allocation6], 0 }
   0x2   :  { %9 = vsyncpa [#allocation4], 0  ;;  %s15_s11 = sshll.u32 %s205_s0, 4  ;;  %s176_s12 = smov [#allocation2]   ;;  %s16_s11 = int_to_ptr.hbm [resolvable:$true] %s15_s11 }
   0x3   :  { %s17_s13 = sshll.u32 %s176_s12, 4  ;;  %s25_s16 = sshll.u32 %s206_s1, 4  ;;  %s18_s13 = int_to_ptr.vmem [resolvable:$true] %s17_s13  ;;  %s26_s16 = int_to_ptr.hbm [resolvable:$true] %s25_s16 }
   0x4   :  { %20 = dma.hbm_to_vmem [thread:$0]  %s16_s11, 32, %s18_s13, [#allocation3]  }
   0x5   :  { %s177_s17 = smov [#allocation5]   ;;  %s178_s19 = smov 128  }
   0x6   :  { %s27_s18 = sshll.u32 %s177_s17, 4  ;;  %s179_s20 = smov 8   ;;  %s28_s18 = int_to_ptr.vmem [resolvable:$true] %s27_s18 }
   0x7   :  { %33 = dma.hbm_to_vmem [thread:$0]  %s26_s16, 256, %s28_s18, [#allocation6], %s178_s19, %s178_s19, %s179_s20  }
   0x8   :  { %170 = dma.done.wait [#allocation3], 32  }
   0x9   :  { %171 = vsyncadd [#allocation3], 4294967264 }
   0xa   :  { %172 = dma.done.wait [#allocation6], 256  }
   0xb   :  { %173 = vsyncadd [#allocation6], 4294967040  ;;  %v44_v0 = vld [vmem:[#allocation5 + $0x8] sm:$0xff]  ;;  %v43_v1 = vld [vmem:[#allocation5] sm:$0xff]  ;;  %vm45_vm0 = vcmask 130048   ;;  %s180_s0 = smov [#allocation7]  }
   0xc   :  { %63 = vmatpush.msra.mxu0 %v44_v0  ;;  %v42_v2 = vld [vmem:[#allocation2] sm:$0x3]  ;;  %s77_s1 = sshll.u32 %s180_s0, 4  ;;  %s79_s23 = sshll.u32 %s207_s2, 4  ;;  %s78_s1 = int_to_ptr.vmem [resolvable:$true] %s77_s1  ;;  %s80_s23 = int_to_ptr.hbm [resolvable:$true] %s79_s23 }
   0xe   :  { %64 = vmatpush.msra.mxu0 %v43_v1 }
   0xf   :  { %90 = vmatmul.msk.f32.vlgmr.msra.gmra.mxu0 %vm45_vm0, %v42_v2 }
  0x8c   :  { %v66_v3 = vpop.f32.mrf.mxu0 }
  0x8d   :  { %96 = vtanh.f32 %v66_v3 }
  0x93   :  { %v97_v4 = vpop.eup %96 }
  0x94   :  { %v70_v5 = vmul.f32 2.0, %v97_v4 }
  0x96   :  { %71 = vst [vmem:[#allocation7] sm:$0x3] %v70_v5 }
  0x97   :  { %82 = dma.vmem_to_hbm [thread:$0]  %s78_s1, 32, %s80_s23, [#allocation4]  }
  0x98   :  { %174 = dma.done.wait [#allocation4], 32  }
  0x99   :  { %175 = vsyncadd [#allocation4], 4294967264 }
  0x9a   :  { %87 = vsyncpa [#allocation3], 1 }
  0x9b   :  { %88 = vsyncpa [#allocation6], 1 }
  0x9c   :  { %89 = vsyncpa [#allocation4], 1 }

</bundles_post_ra>
